<compile_context>
chip_gen: v7x
topology: tpu7x:2x2x1
jax: 0.10.0
libtpu: 0.0.40
codegen_flags: <defaults>
</compile_context>

<pallas_src>
import jax
import jax.numpy as jnp
from jax import lax
from jax.experimental import pallas as pl
from jax.experimental.pallas import tpu as pltpu

# Model / problem sizes (small, consistent with the module)
BATCH = 2
SEQ = 8
EMBED = 32
NUM_HEADS = 4
HEAD_DIM = EMBED // NUM_HEADS


def mha_kernel(x_ref, wqkv_ref, bqkv_ref, wout_ref, bout_ref, o_ref):
    # x_ref: (B*S, E) — whole flattened batch in one block.
    x = x_ref[...].astype(jnp.float32)

    # QKV projection for all tokens of all batch elements at once:
    # (B*S, E) @ (E, 3E) + (1, 3E)
    qkv = jnp.dot(x, wqkv_ref[...], preferred_element_type=jnp.float32)
    qkv = qkv + bqkv_ref[...]                                           # (B*S, 3E)

    scale = 1.0 / (HEAD_DIM ** 0.5)
    q_all = qkv[:, 0:EMBED] * scale        # fold softmax scale into q (not scores)
    k_all = qkv[:, EMBED:2 * EMBED]
    v_all = qkv[:, 2 * EMBED:3 * EMBED]

    # Contract the last dims of q and k directly (q @ k^T without a transpose).
    contract_last = (((1,), (1,)), ((), ()))
    bias_out = bout_ref[...]                                            # (1, E)

    # B*H = 8 tiny blocks -> fully unrolled static Python loops.
    for b in range(BATCH):
        r0 = b * SEQ
        out_b = jnp.zeros((SEQ, EMBED), jnp.float32)
        for h in range(NUM_HEADS):
            c0 = h * HEAD_DIM
            q = q_all[r0:r0 + SEQ, c0:c0 + HEAD_DIM]                    # (S, hd)
            k = k_all[r0:r0 + SEQ, c0:c0 + HEAD_DIM]                    # (S, hd)
            v = v_all[r0:r0 + SEQ, c0:c0 + HEAD_DIM]                    # (S, hd)

            s = lax.dot_general(q, k, dimension_numbers=contract_last,
                                preferred_element_type=jnp.float32)     # (S, S)
            s = s - jnp.max(s, axis=-1, keepdims=True)
            p = jnp.exp(s)
            attn = p * pl.reciprocal(jnp.sum(p, axis=-1, keepdims=True),
                                     approx=False)
            # TODO(synk): attention dropout omitted (eval-mode / identity).

            ho = jnp.dot(attn, v, preferred_element_type=jnp.float32)   # (S, hd)
            # Fold head h's block of the output projection in directly.  This is
            # mathematically identical to concat(heads) @ W_out and removes the
            # head_out scratch / masked 8-lane writes / lane-axis concatenation.
            out_b = out_b + jnp.dot(ho, wout_ref[c0:c0 + HEAD_DIM, :],
                                    preferred_element_type=jnp.float32)  # (S, E)

        o_ref[r0:r0 + SEQ, :] = (out_b + bias_out).astype(o_ref.dtype)


def multi_head_attention(x, w_qkv, b_qkv, w_out, b_out):
    B, S, E = x.shape
    x2d = x.reshape(B * S, E)        # free XLA reshape outside the kernel
    out2d = pl.pallas_call(
        mha_kernel,
        out_shape=jax.ShapeDtypeStruct((B * S, E), x.dtype),
        grid_spec=pltpu.PrefetchScalarGridSpec(
            num_scalar_prefetch=0,
            grid=(1,),                                         # single invocation
            in_specs=[
                pl.BlockSpec((B * S, E), lambda i: (0, 0)),    # x (flattened)
                pl.BlockSpec((E, 3 * E), lambda i: (0, 0)),    # W_qkv
                pl.BlockSpec((1, 3 * E), lambda i: (0, 0)),    # b_qkv
                pl.BlockSpec((E, E), lambda i: (0, 0)),        # W_out
                pl.BlockSpec((1, E), lambda i: (0, 0)),        # b_out
            ],
            out_specs=pl.BlockSpec((B * S, E), lambda i: (0, 0)),
        ),
        compiler_params=pltpu.CompilerParams(
            dimension_semantics=("arbitrary",)),
    )(x2d, w_qkv, b_qkv, w_out, b_out)
    return out2d.reshape(B, S, E)


def reference_mha(x, w_qkv, b_qkv, w_out, b_out):
    """Pure-JAX reference mirroring the PyTorch forward (dropout = identity)."""
    B, S, E = x.shape
    qkv = x @ w_qkv + b_qkv                                   # (B, S, 3E)
    qkv = qkv.reshape(B, S, 3, NUM_HEADS, HEAD_DIM)
    q, k, v = qkv[:, :, 0], qkv[:, :, 1], qkv[:, :, 2]        # (B, S, H, hd)
    q = jnp.transpose(q, (0, 2, 1, 3))                        # (B, H, S, hd)
    k = jnp.transpose(k, (0, 2, 1, 3))
    v = jnp.transpose(v, (0, 2, 1, 3))
    scores = jnp.einsum("bhqd,bhkd->bhqk", q, k) / (HEAD_DIM ** 0.5)
    attn = jax.nn.softmax(scores, axis=-1)
    out = jnp.einsum("bhqk,bhkd->bhqd", attn, v)
    out = jnp.transpose(out, (0, 2, 1, 3)).reshape(B, S, E)
    return out @ w_out + b_out


if __name__ == "__main__":
    key = jax.random.PRNGKey(0)
    kx, k1, k2, k3, k4 = jax.random.split(key, 5)

    # Deterministic parameter init (synthetic; matches nn.Linear shapes,
    # stored transposed as [in, out]).
    x = jax.random.normal(kx, (BATCH, SEQ, EMBED), dtype=jnp.float32)
    w_qkv = jax.random.normal(k1, (EMBED, 3 * EMBED), dtype=jnp.float32) * 0.05
    b_qkv = jax.random.normal(k2, (1, 3 * EMBED), dtype=jnp.float32) * 0.05
    w_out = jax.random.normal(k3, (EMBED, EMBED), dtype=jnp.float32) * 0.05
    b_out = jax.random.normal(k4, (1, EMBED), dtype=jnp.float32) * 0.05

    out = multi_head_attention(x, w_qkv, b_qkv, w_out, b_out)
    out = jax.block_until_ready(out)

    ref = reference_mha(x, w_qkv, b_qkv[0], w_out, b_out[0])
    assert out.shape == (BATCH, SEQ, EMBED)
    assert jnp.allclose(out, ref, atol=1e-4, rtol=1e-4), "mismatch vs reference"

    print("KERNEL_OK")
</pallas_src>

<mosaic_0001>
module attributes {stable_mosaic.version = 11 : i64} {
  func.func @mha_kernel(%arg0: i32, %arg1: memref<16x32xf32, #tpu.memory_space<vmem>>, %arg2: memref<32x96xf32, #tpu.memory_space<vmem>>, %arg3: memref<1x96xf32, #tpu.memory_space<vmem>>, %arg4: memref<32x32xf32, #tpu.memory_space<vmem>>, %arg5: memref<1x32xf32, #tpu.memory_space<vmem>>, %arg6: memref<16x32xf32, #tpu.memory_space<vmem>>) attributes {dimension_semantics = [#tpu.dimension_semantics<arbitrary>], iteration_bounds = array<i64: 1>, scalar_prefetch = 0 : i64, scratch_operands = 0 : i64, tpu.core_type = #tpu.core_type<tc>, window_params = [{pipeline_mode = #tpu.pipeline_mode<synchronous>, transform_indices = @transform_0, window_bounds = array<i64: 16, 32>}, {pipeline_mode = #tpu.pipeline_mode<synchronous>, transform_indices = @transform_1, window_bounds = array<i64: 32, 96>}, {pipeline_mode = #tpu.pipeline_mode<synchronous>, transform_indices = @transform_2, window_bounds = array<i64: 1, 96>}, {pipeline_mode = #tpu.pipeline_mode<synchronous>, transform_indices = @transform_3, window_bounds = array<i64: 32, 32>}, {pipeline_mode = #tpu.pipeline_mode<synchronous>, transform_indices = @transform_4, window_bounds = array<i64: 1, 32>}, {pipeline_mode = #tpu.pipeline_mode<synchronous>, transform_indices = @transform_5, window_bounds = array<i64: 16, 32>}]} {
    %c0 = arith.constant 0 : index
    %c0_0 = arith.constant 0 : index
    %0 = vector.load %arg1[%c0, %c0_0] : memref<16x32xf32, #tpu.memory_space<vmem>>, vector<16x32xf32>
    %c0_1 = arith.constant 0 : index
    %c0_2 = arith.constant 0 : index
    %1 = vector.load %arg2[%c0_1, %c0_2] : memref<32x96xf32, #tpu.memory_space<vmem>>, vector<32x96xf32>
    %cst = arith.constant dense<0.000000e+00> : vector<16x96xf32>
    %2 = tpu.matmul %0, %1, %cst {dimension_numbers = #tpu.dot_dimension_numbers<[1], [0], [0], [1], [0, 0, 1, 1], [], []>} : vector<16x32xf32>, vector<32x96xf32>, vector<16x96xf32> -> vector<16x96xf32>
    %c0_3 = arith.constant 0 : index
    %c0_4 = arith.constant 0 : index
    %3 = vector.load %arg3[%c0_3, %c0_4] : memref<1x96xf32, #tpu.memory_space<vmem>>, vector<1x96xf32>
    %4 = vector.broadcast %3 : vector<1x96xf32> to vector<16x96xf32>
    %5 = arith.addf %2, %4 : vector<16x96xf32>
    %6 = vector.extract_strided_slice %5 {offsets = [0, 0], sizes = [16, 32], strides = [1, 1]} : vector<16x96xf32> to vector<16x32xf32>
    %cst_5 = arith.constant 0.353553385 : f32
    %7 = vector.broadcast %cst_5 : f32 to vector<16x32xf32>
    %8 = arith.mulf %6, %7 : vector<16x32xf32>
    %9 = vector.extract_strided_slice %5 {offsets = [0, 32], sizes = [16, 32], strides = [1, 1]} : vector<16x96xf32> to vector<16x32xf32>
    %10 = vector.extract_strided_slice %5 {offsets = [0, 64], sizes = [16, 32], strides = [1, 1]} : vector<16x96xf32> to vector<16x32xf32>
    %c0_6 = arith.constant 0 : index
    %c0_7 = arith.constant 0 : index
    %11 = vector.load %arg5[%c0_6, %c0_7] : memref<1x32xf32, #tpu.memory_space<vmem>>, vector<1x32xf32>
    %cst_8 = arith.constant 0.000000e+00 : f32
    %12 = vector.broadcast %cst_8 : f32 to vector<8x32xf32>
    %13 = vector.extract_strided_slice %8 {offsets = [0, 0], sizes = [8, 8], strides = [1, 1]} : vector<16x32xf32> to vector<8x8xf32>
    %14 = vector.extract_strided_slice %9 {offsets = [0, 0], sizes = [8, 8], strides = [1, 1]} : vector<16x32xf32> to vector<8x8xf32>
    %15 = vector.extract_strided_slice %10 {offsets = [0, 0], sizes = [8, 8], strides = [1, 1]} : vector<16x32xf32> to vector<8x8xf32>
    %cst_9 = arith.constant dense<0.000000e+00> : vector<8x8xf32>
    %16 = tpu.matmul %13, %14, %cst_9 {dimension_numbers = #tpu.dot_dimension_numbers<[1], [1], [0], [0], [0, 0, 1, 0], [], []>} : vector<8x8xf32>, vector<8x8xf32>, vector<8x8xf32> -> vector<8x8xf32>
    %cst_10 = arith.constant dense<0xFF800000> : vector<8xf32>
    %17 = vector.multi_reduction <maximumf>, %16, %cst_10 [1] : vector<8x8xf32> to vector<8xf32>
    %18 = vector.shape_cast %17 : vector<8xf32> to vector<8x1xf32>
    %19 = vector.broadcast %18 : vector<8x1xf32> to vector<8x8xf32>
    %20 = arith.subf %16, %19 : vector<8x8xf32>
    %21 = math.exp %20 : vector<8x8xf32>
    %cst_11 = arith.constant dense<0.000000e+00> : vector<8xf32>
    %22 = vector.multi_reduction <add>, %21, %cst_11 [1] : vector<8x8xf32> to vector<8xf32>
    %23 = vector.shape_cast %22 : vector<8xf32> to vector<8x1xf32>
    %24 = tpu.reciprocal %23 : vector<8x1xf32> -> vector<8x1xf32>
    %25 = vector.broadcast %24 : vector<8x1xf32> to vector<8x8xf32>
    %26 = arith.mulf %21, %25 : vector<8x8xf32>
    %cst_12 = arith.constant dense<0.000000e+00> : vector<8x8xf32>
    %27 = tpu.matmul %26, %15, %cst_12 {dimension_numbers = #tpu.dot_dimension_numbers<[1], [0], [0], [1], [0, 0, 1, 1], [], []>} : vector<8x8xf32>, vector<8x8xf32>, vector<8x8xf32> -> vector<8x8xf32>
    %c0_13 = arith.constant 0 : index
    %c0_14 = arith.constant 0 : index
    %28 = vector.load %arg4[%c0_13, %c0_14] : memref<32x32xf32, #tpu.memory_space<vmem>>, vector<8x32xf32>
    %cst_15 = arith.constant dense<0.000000e+00> : vector<8x32xf32>
    %29 = tpu.matmul %27, %28, %cst_15 {dimension_numbers = #tpu.dot_dimension_numbers<[1], [0], [0], [1], [0, 0, 1, 1], [], []>} : vector<8x8xf32>, vector<8x32xf32>, vector<8x32xf32> -> vector<8x32xf32>
    %30 = arith.addf %12, %29 : vector<8x32xf32>
    %31 = vector.extract_strided_slice %8 {offsets = [0, 8], sizes = [8, 8], strides = [1, 1]} : vector<16x32xf32> to vector<8x8xf32>
    %32 = vector.extract_strided_slice %9 {offsets = [0, 8], sizes = [8, 8], strides = [1, 1]} : vector<16x32xf32> to vector<8x8xf32>
    %33 = vector.extract_strided_slice %10 {offsets = [0, 8], sizes = [8, 8], strides = [1, 1]} : vector<16x32xf32> to vector<8x8xf32>
    %cst_16 = arith.constant dense<0.000000e+00> : vector<8x8xf32>
    %34 = tpu.matmul %31, %32, %cst_16 {dimension_numbers = #tpu.dot_dimension_numbers<[1], [1], [0], [0], [0, 0, 1, 0], [], []>} : vector<8x8xf32>, vector<8x8xf32>, vector<8x8xf32> -> vector<8x8xf32>
    %cst_17 = arith.constant dense<0xFF800000> : vector<8xf32>
    %35 = vector.multi_reduction <maximumf>, %34, %cst_17 [1] : vector<8x8xf32> to vector<8xf32>
    %36 = vector.shape_cast %35 : vector<8xf32> to vector<8x1xf32>
    %37 = vector.broadcast %36 : vector<8x1xf32> to vector<8x8xf32>
    %38 = arith.subf %34, %37 : vector<8x8xf32>
    %39 = math.exp %38 : vector<8x8xf32>
    %cst_18 = arith.constant dense<0.000000e+00> : vector<8xf32>
    %40 = vector.multi_reduction <add>, %39, %cst_18 [1] : vector<8x8xf32> to vector<8xf32>
    %41 = vector.shape_cast %40 : vector<8xf32> to vector<8x1xf32>
    %42 = tpu.reciprocal %41 : vector<8x1xf32> -> vector<8x1xf32>
    %43 = vector.broadcast %42 : vector<8x1xf32> to vector<8x8xf32>
    %44 = arith.mulf %39, %43 : vector<8x8xf32>
    %cst_19 = arith.constant dense<0.000000e+00> : vector<8x8xf32>
    %45 = tpu.matmul %44, %33, %cst_19 {dimension_numbers = #tpu.dot_dimension_numbers<[1], [0], [0], [1], [0, 0, 1, 1], [], []>} : vector<8x8xf32>, vector<8x8xf32>, vector<8x8xf32> -> vector<8x8xf32>
    %c8 = arith.constant 8 : index
    %c0_20 = arith.constant 0 : index
    %46 = vector.load %arg4[%c8, %c0_20] : memref<32x32xf32, #tpu.memory_space<vmem>>, vector<8x32xf32>
    %cst_21 = arith.constant dense<0.000000e+00> : vector<8x32xf32>
    %47 = tpu.matmul %45, %46, %cst_21 {dimension_numbers = #tpu.dot_dimension_numbers<[1], [0], [0], [1], [0, 0, 1, 1], [], []>} : vector<8x8xf32>, vector<8x32xf32>, vector<8x32xf32> -> vector<8x32xf32>
    %48 = arith.addf %30, %47 : vector<8x32xf32>
    %49 = vector.extract_strided_slice %8 {offsets = [0, 16], sizes = [8, 8], strides = [1, 1]} : vector<16x32xf32> to vector<8x8xf32>
    %50 = vector.extract_strided_slice %9 {offsets = [0, 16], sizes = [8, 8], strides = [1, 1]} : vector<16x32xf32> to vector<8x8xf32>
    %51 = vector.extract_strided_slice %10 {offsets = [0, 16], sizes = [8, 8], strides = [1, 1]} : vector<16x32xf32> to vector<8x8xf32>
    %cst_22 = arith.constant dense<0.000000e+00> : vector<8x8xf32>
    %52 = tpu.matmul %49, %50, %cst_22 {dimension_numbers = #tpu.dot_dimension_numbers<[1], [1], [0], [0], [0, 0, 1, 0], [], []>} : vector<8x8xf32>, vector<8x8xf32>, vector<8x8xf32> -> vector<8x8xf32>
    %cst_23 = arith.constant dense<0xFF800000> : vector<8xf32>
    %53 = vector.multi_reduction <maximumf>, %52, %cst_23 [1] : vector<8x8xf32> to vector<8xf32>
    %54 = vector.shape_cast %53 : vector<8xf32> to vector<8x1xf32>
    %55 = vector.broadcast %54 : vector<8x1xf32> to vector<8x8xf32>
    %56 = arith.subf %52, %55 : vector<8x8xf32>
    %57 = math.exp %56 : vector<8x8xf32>
    %cst_24 = arith.constant dense<0.000000e+00> : vector<8xf32>
    %58 = vector.multi_reduction <add>, %57, %cst_24 [1] : vector<8x8xf32> to vector<8xf32>
    %59 = vector.shape_cast %58 : vector<8xf32> to vector<8x1xf32>
    %60 = tpu.reciprocal %59 : vector<8x1xf32> -> vector<8x1xf32>
    %61 = vector.broadcast %60 : vector<8x1xf32> to vector<8x8xf32>
    %62 = arith.mulf %57, %61 : vector<8x8xf32>
    %cst_25 = arith.constant dense<0.000000e+00> : vector<8x8xf32>
    %63 = tpu.matmul %62, %51, %cst_25 {dimension_numbers = #tpu.dot_dimension_numbers<[1], [0], [0], [1], [0, 0, 1, 1], [], []>} : vector<8x8xf32>, vector<8x8xf32>, vector<8x8xf32> -> vector<8x8xf32>
    %c16 = arith.constant 16 : index
    %c0_26 = arith.constant 0 : index
    %64 = vector.load %arg4[%c16, %c0_26] : memref<32x32xf32, #tpu.memory_space<vmem>>, vector<8x32xf32>
    %cst_27 = arith.constant dense<0.000000e+00> : vector<8x32xf32>
    %65 = tpu.matmul %63, %64, %cst_27 {dimension_numbers = #tpu.dot_dimension_numbers<[1], [0], [0], [1], [0, 0, 1, 1], [], []>} : vector<8x8xf32>, vector<8x32xf32>, vector<8x32xf32> -> vector<8x32xf32>
    %66 = arith.addf %48, %65 : vector<8x32xf32>
    %67 = vector.extract_strided_slice %8 {offsets = [0, 24], sizes = [8, 8], strides = [1, 1]} : vector<16x32xf32> to vector<8x8xf32>
    %68 = vector.extract_strided_slice %9 {offsets = [0, 24], sizes = [8, 8], strides = [1, 1]} : vector<16x32xf32> to vector<8x8xf32>
    %69 = vector.extract_strided_slice %10 {offsets = [0, 24], sizes = [8, 8], strides = [1, 1]} : vector<16x32xf32> to vector<8x8xf32>
    %cst_28 = arith.constant dense<0.000000e+00> : vector<8x8xf32>
    %70 = tpu.matmul %67, %68, %cst_28 {dimension_numbers = #tpu.dot_dimension_numbers<[1], [1], [0], [0], [0, 0, 1, 0], [], []>} : vector<8x8xf32>, vector<8x8xf32>, vector<8x8xf32> -> vector<8x8xf32>
    %cst_29 = arith.constant dense<0xFF800000> : vector<8xf32>
    %71 = vector.multi_reduction <maximumf>, %70, %cst_29 [1] : vector<8x8xf32> to vector<8xf32>
    %72 = vector.shape_cast %71 : vector<8xf32> to vector<8x1xf32>
    %73 = vector.broadcast %72 : vector<8x1xf32> to vector<8x8xf32>
    %74 = arith.subf %70, %73 : vector<8x8xf32>
    %75 = math.exp %74 : vector<8x8xf32>
    %cst_30 = arith.constant dense<0.000000e+00> : vector<8xf32>
    %76 = vector.multi_reduction <add>, %75, %cst_30 [1] : vector<8x8xf32> to vector<8xf32>
    %77 = vector.shape_cast %76 : vector<8xf32> to vector<8x1xf32>
    %78 = tpu.reciprocal %77 : vector<8x1xf32> -> vector<8x1xf32>
    %79 = vector.broadcast %78 : vector<8x1xf32> to vector<8x8xf32>
    %80 = arith.mulf %75, %79 : vector<8x8xf32>
    %cst_31 = arith.constant dense<0.000000e+00> : vector<8x8xf32>
    %81 = tpu.matmul %80, %69, %cst_31 {dimension_numbers = #tpu.dot_dimension_numbers<[1], [0], [0], [1], [0, 0, 1, 1], [], []>} : vector<8x8xf32>, vector<8x8xf32>, vector<8x8xf32> -> vector<8x8xf32>
    %c24 = arith.constant 24 : index
    %c0_32 = arith.constant 0 : index
    %82 = vector.load %arg4[%c24, %c0_32] : memref<32x32xf32, #tpu.memory_space<vmem>>, vector<8x32xf32>
    %cst_33 = arith.constant dense<0.000000e+00> : vector<8x32xf32>
    %83 = tpu.matmul %81, %82, %cst_33 {dimension_numbers = #tpu.dot_dimension_numbers<[1], [0], [0], [1], [0, 0, 1, 1], [], []>} : vector<8x8xf32>, vector<8x32xf32>, vector<8x32xf32> -> vector<8x32xf32>
    %84 = arith.addf %66, %83 : vector<8x32xf32>
    %85 = vector.broadcast %11 : vector<1x32xf32> to vector<8x32xf32>
    %86 = arith.addf %84, %85 : vector<8x32xf32>
    %c0_34 = arith.constant 0 : index
    %c0_35 = arith.constant 0 : index
    %87 = vector.load %arg6[%c0_34, %c0_35] : memref<16x32xf32, #tpu.memory_space<vmem>>, vector<8x32xf32>
    tpu.vector_store %arg6[%c0_34, %c0_35], %86 {strides = array<i32>} : memref<16x32xf32, #tpu.memory_space<vmem>>, vector<8x32xf32>,
    %cst_36 = arith.constant 0.000000e+00 : f32
    %88 = vector.broadcast %cst_36 : f32 to vector<8x32xf32>
    %89 = vector.extract_strided_slice %8 {offsets = [8, 0], sizes = [8, 8], strides = [1, 1]} : vector<16x32xf32> to vector<8x8xf32>
    %90 = vector.extract_strided_slice %9 {offsets = [8, 0], sizes = [8, 8], strides = [1, 1]} : vector<16x32xf32> to vector<8x8xf32>
    %91 = vector.extract_strided_slice %10 {offsets = [8, 0], sizes = [8, 8], strides = [1, 1]} : vector<16x32xf32> to vector<8x8xf32>
    %cst_37 = arith.constant dense<0.000000e+00> : vector<8x8xf32>
    %92 = tpu.matmul %89, %90, %cst_37 {dimension_numbers = #tpu.dot_dimension_numbers<[1], [1], [0], [0], [0, 0, 1, 0], [], []>} : vector<8x8xf32>, vector<8x8xf32>, vector<8x8xf32> -> vector<8x8xf32>
    %cst_38 = arith.constant dense<0xFF800000> : vector<8xf32>
    %93 = vector.multi_reduction <maximumf>, %92, %cst_38 [1] : vector<8x8xf32> to vector<8xf32>
    %94 = vector.shape_cast %93 : vector<8xf32> to vector<8x1xf32>
    %95 = vector.broadcast %94 : vector<8x1xf32> to vector<8x8xf32>
    %96 = arith.subf %92, %95 : vector<8x8xf32>
    %97 = math.exp %96 : vector<8x8xf32>
    %cst_39 = arith.constant dense<0.000000e+00> : vector<8xf32>
    %98 = vector.multi_reduction <add>, %97, %cst_39 [1] : vector<8x8xf32> to vector<8xf32>
    %99 = vector.shape_cast %98 : vector<8xf32> to vector<8x1xf32>
    %100 = tpu.reciprocal %99 : vector<8x1xf32> -> vector<8x1xf32>
    %101 = vector.broadcast %100 : vector<8x1xf32> to vector<8x8xf32>
    %102 = arith.mulf %97, %101 : vector<8x8xf32>
    %cst_40 = arith.constant dense<0.000000e+00> : vector<8x8xf32>
    %103 = tpu.matmul %102, %91, %cst_40 {dimension_numbers = #tpu.dot_dimension_numbers<[1], [0], [0], [1], [0, 0, 1, 1], [], []>} : vector<8x8xf32>, vector<8x8xf32>, vector<8x8xf32> -> vector<8x8xf32>
    %c0_41 = arith.constant 0 : index
    %c0_42 = arith.constant 0 : index
    %104 = vector.load %arg4[%c0_41, %c0_42] : memref<32x32xf32, #tpu.memory_space<vmem>>, vector<8x32xf32>
    %cst_43 = arith.constant dense<0.000000e+00> : vector<8x32xf32>
    %105 = tpu.matmul %103, %104, %cst_43 {dimension_numbers = #tpu.dot_dimension_numbers<[1], [0], [0], [1], [0, 0, 1, 1], [], []>} : vector<8x8xf32>, vector<8x32xf32>, vector<8x32xf32> -> vector<8x32xf32>
    %106 = arith.addf %88, %105 : vector<8x32xf32>
    %107 = vector.extract_strided_slice %8 {offsets = [8, 8], sizes = [8, 8], strides = [1, 1]} : vector<16x32xf32> to vector<8x8xf32>
    %108 = vector.extract_strided_slice %9 {offsets = [8, 8], sizes = [8, 8], strides = [1, 1]} : vector<16x32xf32> to vector<8x8xf32>
    %109 = vector.extract_strided_slice %10 {offsets = [8, 8], sizes = [8, 8], strides = [1, 1]} : vector<16x32xf32> to vector<8x8xf32>
    %cst_44 = arith.constant dense<0.000000e+00> : vector<8x8xf32>
    %110 = tpu.matmul %107, %108, %cst_44 {dimension_numbers = #tpu.dot_dimension_numbers<[1], [1], [0], [0], [0, 0, 1, 0], [], []>} : vector<8x8xf32>, vector<8x8xf32>, vector<8x8xf32> -> vector<8x8xf32>
    %cst_45 = arith.constant dense<0xFF800000> : vector<8xf32>
    %111 = vector.multi_reduction <maximumf>, %110, %cst_45 [1] : vector<8x8xf32> to vector<8xf32>
    %112 = vector.shape_cast %111 : vector<8xf32> to vector<8x1xf32>
    %113 = vector.broadcast %112 : vector<8x1xf32> to vector<8x8xf32>
    %114 = arith.subf %110, %113 : vector<8x8xf32>
    %115 = math.exp %114 : vector<8x8xf32>
    %cst_46 = arith.constant dense<0.000000e+00> : vector<8xf32>
    %116 = vector.multi_reduction <add>, %115, %cst_46 [1] : vector<8x8xf32> to vector<8xf32>
    %117 = vector.shape_cast %116 : vector<8xf32> to vector<8x1xf32>
    %118 = tpu.reciprocal %117 : vector<8x1xf32> -> vector<8x1xf32>
    %119 = vector.broadcast %118 : vector<8x1xf32> to vector<8x8xf32>
    %120 = arith.mulf %115, %119 : vector<8x8xf32>
    %cst_47 = arith.constant dense<0.000000e+00> : vector<8x8xf32>
    %121 = tpu.matmul %120, %109, %cst_47 {dimension_numbers = #tpu.dot_dimension_numbers<[1], [0], [0], [1], [0, 0, 1, 1], [], []>} : vector<8x8xf32>, vector<8x8xf32>, vector<8x8xf32> -> vector<8x8xf32>
    %c8_48 = arith.constant 8 : index
    %c0_49 = arith.constant 0 : index
    %122 = vector.load %arg4[%c8_48, %c0_49] : memref<32x32xf32, #tpu.memory_space<vmem>>, vector<8x32xf32>
    %cst_50 = arith.constant dense<0.000000e+00> : vector<8x32xf32>
    %123 = tpu.matmul %121, %122, %cst_50 {dimension_numbers = #tpu.dot_dimension_numbers<[1], [0], [0], [1], [0, 0, 1, 1], [], []>} : vector<8x8xf32>, vector<8x32xf32>, vector<8x32xf32> -> vector<8x32xf32>
    %124 = arith.addf %106, %123 : vector<8x32xf32>
    %125 = vector.extract_strided_slice %8 {offsets = [8, 16], sizes = [8, 8], strides = [1, 1]} : vector<16x32xf32> to vector<8x8xf32>
    %126 = vector.extract_strided_slice %9 {offsets = [8, 16], sizes = [8, 8], strides = [1, 1]} : vector<16x32xf32> to vector<8x8xf32>
    %127 = vector.extract_strided_slice %10 {offsets = [8, 16], sizes = [8, 8], strides = [1, 1]} : vector<16x32xf32> to vector<8x8xf32>
    %cst_51 = arith.constant dense<0.000000e+00> : vector<8x8xf32>
    %128 = tpu.matmul %125, %126, %cst_51 {dimension_numbers = #tpu.dot_dimension_numbers<[1], [1], [0], [0], [0, 0, 1, 0], [], []>} : vector<8x8xf32>, vector<8x8xf32>, vector<8x8xf32> -> vector<8x8xf32>
    %cst_52 = arith.constant dense<0xFF800000> : vector<8xf32>
    %129 = vector.multi_reduction <maximumf>, %128, %cst_52 [1] : vector<8x8xf32> to vector<8xf32>
    %130 = vector.shape_cast %129 : vector<8xf32> to vector<8x1xf32>
    %131 = vector.broadcast %130 : vector<8x1xf32> to vector<8x8xf32>
    %132 = arith.subf %128, %131 : vector<8x8xf32>
    %133 = math.exp %132 : vector<8x8xf32>
    %cst_53 = arith.constant dense<0.000000e+00> : vector<8xf32>
    %134 = vector.multi_reduction <add>, %133, %cst_53 [1] : vector<8x8xf32> to vector<8xf32>
    %135 = vector.shape_cast %134 : vector<8xf32> to vector<8x1xf32>
    %136 = tpu.reciprocal %135 : vector<8x1xf32> -> vector<8x1xf32>
    %137 = vector.broadcast %136 : vector<8x1xf32> to vector<8x8xf32>
    %138 = arith.mulf %133, %137 : vector<8x8xf32>
    %cst_54 = arith.constant dense<0.000000e+00> : vector<8x8xf32>
    %139 = tpu.matmul %138, %127, %cst_54 {dimension_numbers = #tpu.dot_dimension_numbers<[1], [0], [0], [1], [0, 0, 1, 1], [], []>} : vector<8x8xf32>, vector<8x8xf32>, vector<8x8xf32> -> vector<8x8xf32>
    %c16_55 = arith.constant 16 : index
    %c0_56 = arith.constant 0 : index
    %140 = vector.load %arg4[%c16_55, %c0_56] : memref<32x32xf32, #tpu.memory_space<vmem>>, vector<8x32xf32>
    %cst_57 = arith.constant dense<0.000000e+00> : vector<8x32xf32>
    %141 = tpu.matmul %139, %140, %cst_57 {dimension_numbers = #tpu.dot_dimension_numbers<[1], [0], [0], [1], [0, 0, 1, 1], [], []>} : vector<8x8xf32>, vector<8x32xf32>, vector<8x32xf32> -> vector<8x32xf32>
    %142 = arith.addf %124, %141 : vector<8x32xf32>
    %143 = vector.extract_strided_slice %8 {offsets = [8, 24], sizes = [8, 8], strides = [1, 1]} : vector<16x32xf32> to vector<8x8xf32>
    %144 = vector.extract_strided_slice %9 {offsets = [8, 24], sizes = [8, 8], strides = [1, 1]} : vector<16x32xf32> to vector<8x8xf32>
    %145 = vector.extract_strided_slice %10 {offsets = [8, 24], sizes = [8, 8], strides = [1, 1]} : vector<16x32xf32> to vector<8x8xf32>
    %cst_58 = arith.constant dense<0.000000e+00> : vector<8x8xf32>
    %146 = tpu.matmul %143, %144, %cst_58 {dimension_numbers = #tpu.dot_dimension_numbers<[1], [1], [0], [0], [0, 0, 1, 0], [], []>} : vector<8x8xf32>, vector<8x8xf32>, vector<8x8xf32> -> vector<8x8xf32>
    %cst_59 = arith.constant dense<0xFF800000> : vector<8xf32>
    %147 = vector.multi_reduction <maximumf>, %146, %cst_59 [1] : vector<8x8xf32> to vector<8xf32>
    %148 = vector.shape_cast %147 : vector<8xf32> to vector<8x1xf32>
    %149 = vector.broadcast %148 : vector<8x1xf32> to vector<8x8xf32>
    %150 = arith.subf %146, %149 : vector<8x8xf32>
    %151 = math.exp %150 : vector<8x8xf32>
    %cst_60 = arith.constant dense<0.000000e+00> : vector<8xf32>
    %152 = vector.multi_reduction <add>, %151, %cst_60 [1] : vector<8x8xf32> to vector<8xf32>
    %153 = vector.shape_cast %152 : vector<8xf32> to vector<8x1xf32>
    %154 = tpu.reciprocal %153 : vector<8x1xf32> -> vector<8x1xf32>
    %155 = vector.broadcast %154 : vector<8x1xf32> to vector<8x8xf32>
    %156 = arith.mulf %151, %155 : vector<8x8xf32>
    %cst_61 = arith.constant dense<0.000000e+00> : vector<8x8xf32>
    %157 = tpu.matmul %156, %145, %cst_61 {dimension_numbers = #tpu.dot_dimension_numbers<[1], [0], [0], [1], [0, 0, 1, 1], [], []>} : vector<8x8xf32>, vector<8x8xf32>, vector<8x8xf32> -> vector<8x8xf32>
    %c24_62 = arith.constant 24 : index
    %c0_63 = arith.constant 0 : index
    %158 = vector.load %arg4[%c24_62, %c0_63] : memref<32x32xf32, #tpu.memory_space<vmem>>, vector<8x32xf32>
    %cst_64 = arith.constant dense<0.000000e+00> : vector<8x32xf32>
    %159 = tpu.matmul %157, %158, %cst_64 {dimension_numbers = #tpu.dot_dimension_numbers<[1], [0], [0], [1], [0, 0, 1, 1], [], []>} : vector<8x8xf32>, vector<8x32xf32>, vector<8x32xf32> -> vector<8x32xf32>
    %160 = arith.addf %142, %159 : vector<8x32xf32>
    %161 = vector.broadcast %11 : vector<1x32xf32> to vector<8x32xf32>
    %162 = arith.addf %160, %161 : vector<8x32xf32>
    %c8_65 = arith.constant 8 : index
    %c0_66 = arith.constant 0 : index
    %163 = vector.load %arg6[%c8_65, %c0_66] : memref<16x32xf32, #tpu.memory_space<vmem>>, vector<8x32xf32>
    tpu.vector_store %arg6[%c8_65, %c0_66], %162 {strides = array<i32>} : memref<16x32xf32, #tpu.memory_space<vmem>>, vector<8x32xf32>,
    return
  }
  func.func @transform_0(%arg0: i32) -> (i32, i32) {
    %c0_i32 = arith.constant 0 : i32
    %c0_i32_0 = arith.constant 0 : i32
    %c0_i32_1 = arith.constant 0 : i32
    return %c0_i32, %c0_i32_0 : i32, i32
  }
  func.func @transform_1(%arg0: i32) -> (i32, i32) {
    %c0_i32 = arith.constant 0 : i32
    %c0_i32_0 = arith.constant 0 : i32
    %c0_i32_1 = arith.constant 0 : i32
    return %c0_i32, %c0_i32_0 : i32, i32
  }
  func.func @transform_2(%arg0: i32) -> (i32, i32) {
    %c0_i32 = arith.constant 0 : i32
    %c0_i32_0 = arith.constant 0 : i32
    %c0_i32_1 = arith.constant 0 : i32
    return %c0_i32, %c0_i32_0 : i32, i32
  }
  func.func @transform_3(%arg0: i32) -> (i32, i32) {
    %c0_i32 = arith.constant 0 : i32
    %c0_i32_0 = arith.constant 0 : i32
    %c0_i32_1 = arith.constant 0 : i32
    return %c0_i32, %c0_i32_0 : i32, i32
  }
  func.func @transform_4(%arg0: i32) -> (i32, i32) {
    %c0_i32 = arith.constant 0 : i32
    %c0_i32_0 = arith.constant 0 : i32
    %c0_i32_1 = arith.constant 0 : i32
    return %c0_i32, %c0_i32_0 : i32, i32
  }
  func.func @transform_5(%arg0: i32) -> (i32, i32) {
    %c0_i32 = arith.constant 0 : i32
    %c0_i32_0 = arith.constant 0 : i32
    %c0_i32_1 = arith.constant 0 : i32
    return %c0_i32, %c0_i32_0 : i32, i32
  }
}

</mosaic_0001>

<bundles_post_ra>
// kernel: tpu_custom_call.1
= control target key start
LH: loop header
LB: loop body
LE: loop exit
PB: predicated region body
PF: predicated region fallthrough
CT: control target
= control target key end

     0   :  { %10 = vsyncpa [#allocation3], 0  ;;  %s2801_s0 = inlined_call_operand.hbm [shape: f32[16,32], index: 0, kind: input, shape index: {}]   ;;  %s2802_s1 = inlined_call_operand.hbm [shape: f32[32,96], index: 1, kind: input, shape index: {}]   ;;  %s2803_s2 = inlined_call_operand.vmem [shape: f32[1,96], index: 2, kind: input, shape index: {}]   ;;  %s2804_s3 = inlined_call_operand.hbm [shape: f32[32,32], index: 3, kind: input, shape index: {}]   ;;  %s2805_s4 = inlined_call_operand.vmem [shape: f32[1,32], index: 4, kind: input, shape index: {}]   ;;  %s2806_s5 = inlined_call_operand.hbm [shape: f32[16,32], index: 5, kind: output, shape index: {}]  }
   0x1   :  { %11 = vsyncpa [#allocation6], 0 }
   0x2   :  { %12 = vsyncpa [#allocation4], 0  ;;  %s2479_s18 = smov [#allocation5]   ;;  %s2480_s20 = smov [#allocation2]  }
   0x3   :  { %s30_s19 = sshll.u32 %s2479_s18, 4  ;;  %s18_s21 = sshll.u32 %s2480_s20, 4  ;;  %s31_s19 = int_to_ptr.vmem [resolvable:$true] %s30_s19  ;;  %s2528_s21 = int_to_ptr.vmem [resolvable:$true] %s18_s21 }
   0x4   :  { %s2385_s24 = scalar_lea.hbm %s2802_s1, 512 }
   0x5   :  { %p2386_p0 = scmp.ne.s32.totalorder %s2802_s1, %s2385_s24  ;;  %p2389_p1 = scmp.lt.u32.totalorder %s2385_s24, %s2802_s1 }
   0x7   :  { %p2391_p2 = pnand %p2389_p1, %p2386_p0 }
   0x9   :  { %2394 = shalt.err (!%p2391_p2)
}
   0xa   :  { %s2395_s29 = scalar_lea.vmem %s31_s19, 512  ;;  %p2400_p4 = scmp.lt.s32.totalorder %s31_s19, %s31_s19 }
   0xb   :  { %p2396_p3 = scmp.ne.s32.totalorder %s31_s19, %s2395_s29  ;;  %p2401_p5 = scmp.lt.s32.totalorder %s2395_s29, %s2395_s29 }
   0xd   :  { %p2402_p6 = por %p2401_p5, %p2400_p4 }
   0xf   :  { %p2403_p7 = pnand %p2402_p6, %p2396_p3 }
  0x11   :  { %2406 = shalt.err (!%p2403_p7)
}
  0x12   :  { %s2481_s30 = smov 128   ;;  %s2482_s6 = smov 8  }
  0x13   :  { %36 = dma.hbm_to_vmem [thread:$0]  %s2802_s1, 512, %s31_s19, [#allocation6], %s2481_s30, %s2481_s30, %s2482_s6  }
  0x14   :  { %s2407_s11 = scalar_lea.hbm %s2801_s0, 256 }
  0x15   :  { %p2408_p8 = scmp.ne.s32.totalorder %s2801_s0, %s2407_s11  ;;  %p2411_p9 = scmp.lt.u32.totalorder %s2407_s11, %s2801_s0 }
  0x17   :  { %p2413_p10 = pnand %p2411_p9, %p2408_p8 }
  0x19   :  { %2416 = shalt.err (!%p2413_p10)
}
  0x1a   :  { %s2417_s16 = scalar_lea.vmem %s2528_s21, 256  ;;  %p2422_p12 = scmp.lt.s32.totalorder %s2528_s21, %s2528_s21 }
  0x1b   :  { %p2418_p11 = scmp.ne.s32.totalorder %s2528_s21, %s2417_s16  ;;  %p2423_p13 = scmp.lt.s32.totalorder %s2417_s16, %s2417_s16 }
  0x1d   :  { %p2424_p0 = por %p2423_p13, %p2422_p12 }
  0x1f   :  { %p2425_p1 = pnand %p2424_p0, %p2418_p11 }
  0x21   :  { %2428 = shalt.err (!%p2425_p1)
}
  0x22   :  { %24 = dma.hbm_to_vmem [thread:$0]  %s2801_s0, 256, %s2528_s21, [#allocation3], %s2481_s30, %s2481_s30, %s2482_s6  }
  0x23   :  { %s2483_s18 = smov [#allocation7]   ;;  %s2429_s23 = scalar_lea.hbm %s2804_s3, 512 }
  0x24   :  { %s44_s19 = sshll.u32 %s2483_s18, 4  ;;  %p2430_p2 = scmp.ne.s32.totalorder %s2804_s3, %s2429_s23  ;;  %s45_s19 = int_to_ptr.vmem [resolvable:$true] %s44_s19 }
  0x25   :  { %p2433_p3 = scmp.lt.u32.totalorder %s2429_s23, %s2804_s3 }
  0x27   :  { %p2435_p4 = pnand %p2433_p3, %p2430_p2 }
  0x29   :  { %2438 = shalt.err (!%p2435_p4)
}
  0x2a   :  { %s2439_s28 = scalar_lea.vmem %s45_s19, 512  ;;  %p2444_p6 = scmp.lt.s32.totalorder %s45_s19, %s45_s19 }
  0x2b   :  { %p2440_p5 = scmp.ne.s32.totalorder %s45_s19, %s2439_s28  ;;  %p2445_p7 = scmp.lt.s32.totalorder %s2439_s28, %s2439_s28 }
  0x2d   :  { %p2446_p8 = por %p2445_p7, %p2444_p6 }
  0x2f   :  { %p2447_p9 = pnand %p2446_p8, %p2440_p5 }
  0x31   :  { %2450 = shalt.err (!%p2447_p9)
}
  0x32   :  { %50 = dma.hbm_to_vmem [thread:$0]  %s2804_s3, 512, %s45_s19, [#allocation6], %s2481_s30, %s2481_s30, %s2482_s6  }
  0x33   :  { %2473 = dma.done.wait [#allocation3], 256  }
  0x34   :  { %2474 = vsyncadd [#allocation3], 4294967040 }
  0x35   :  { %2475 = dma.done.wait [#allocation6], 1024  }
  0x36   :  { %2476 = vsyncadd [#allocation6], 4294966272  ;;  %vm75_vm0 = vcmask 261120   ;;  %v64_v0 = vld [vmem:[#allocation5] sm:$0xff]  ;;  %v65_v1 = vld [vmem:[#allocation5 + $0x8] sm:$0xff]  ;;  %v2484_v8 = vmov 0.0  }
  0x37   :  { %v66_v2 = vld [vmem:[#allocation5 + $0x10] sm:$0xff]  ;;  %v2326_v3 = vpack.c.bf16 %v65_v1, %v64_v0  ;;  %v67_v4 = vld [vmem:[#allocation5 + $0x18] sm:$0xff]  ;;  %2206 = vmatprep.subr.mxu1 %v2484_v8  ;;  %vm2485_vm1 = vmmov 0   ;;  %s2486_s7 = smov 96   ;;  %s2487_s8 = smov 120   ;;  %vm163_vm2 = vcmask 64512  }
  0x38   :  { %v62_v5 = vld [vmem:[#allocation2] sm:$0xff]  ;;  %v2330_v6 = vpack.c.bf16 %v67_v4, %v66_v2  ;;  %v63_v7 = vld [vmem:[#allocation2 + $0x8] sm:$0xff]  ;;  %2208 = vmatprep.mubr.msk.f32.mxu1 %vm2485_vm1, %v2484_v8  ;;  %s2488_s9 = smov 88   ;;  %s2490_s10 = smov 64   ;;  %v2627_v34 = vld [vmem:[#allocation7 + $0x8] sm:$0xff] }
  0x39   :  { %2203 = vmatprep.mubr.msk.f32.mxu0 %vm75_vm0, %v62_v5  ;;  %2327 = vmatprep.subr.bf16.mxu0 %v2326_v3  ;;  %v2105_v9 = vld [vmem:[%s2803_s2] ss:$0 sm:$0xff]  ;;  %s2489_s2 = smov 56   ;;  %s2491_s11 = smov 80   ;;  %v2639_v43 = vld [vmem:[#allocation7] sm:$0xff] }
  0x3a   :  { %2329 = vmatpush3.bf16.msra.mxu0 %v2326_v3  ;;  %s2492_s12 = smov 112   ;;  %s2493_s13 = smov 72   ;;  %v2673_v5 = vld [vmem:[#allocation7 + $0x10] sm:$0xff] }
  0x3b   :  { %2331 = vmatprep.subr.bf16.mxu0 %v2330_v6  ;;  %s2494_s14 = smov 104   ;;  %s2495_s15 = smov 48  }
  0x3c   :  { %s2496_s16 = smov 40  }
  0x3e   :  { %2333 = vmatpush3.bf16.msra.mxu0 %v2330_v6 }
  0x3f   :  { %2216 = vmatprep.subr.mxu0 %v2484_v8 }
  0x41   :  { %2204 = vmatmul.mubr.msk.f32.vlgmr.msra.gmra.mrb[0].mxu0 %vm75_vm0, %v63_v7 }
  0x42   :  { %2218 = vmatprep.mubr.msk.f32.mxu0 %vm2485_vm1, %v2484_v8 }
 0x114   :  { %v2205_v10 = vpop.f32.mrb[0].mxu0 }
 0x115   :  { %v2591_v11 = vadd.f32 %v2205_v10, %v2105_v9  ;;  %v148_v12 = vpop.f32.mrb[1].mxu0 }
 0x116   :  { %v2593_v13 = vadd.f32 %v2105_v9, %v148_v12 }
 0x118   :  { %161 = vrot.lane.b32.xlu0 %v2593_v13, %s2486_s7  ;;  %v2598_v14 = vmul.f32 0.35355338, %v2593_v13 }
 0x11a   :  { %327 = vrot.lane.b32.xlu1 %v2598_v14, %s2487_s8 }
 0x11c   :  { %329 = vrot.lane.b32.xlu0 %v2593_v13, %s2488_s9 }
 0x18a   :  { %v162_v15 = vpop.permute.xlu0 %161 }
 0x18b   :  { %2207 = vmatpush3.xpose.msk.msra.mxu1 %vm163_vm2, %v162_v15 }
 0x18c   :  { %2211 = vmatprep.subr.mxu1 %v2484_v8  ;;  %v328_v17 = vpop.permute.xlu1 %327 }
 0x18e   :  { %v330_v16 = vpop.permute.xlu0 %329  ;;  %2209 = vmatmul.mubr.msk.f32.vlgmr.msra.gmra.mrb[0].mxu1 %vm163_vm2, %v2598_v14 }
 0x18f   :  { %2217 = vmatpush3.xpose.msk.msra.mxu0 %vm163_vm2, %v330_v16  ;;  %2213 = vmatprep.mubr.msk.f32.mxu1 %vm2485_vm1, %v2484_v8 }
 0x190   :  { %2226 = vmatprep.subr.mxu0 %v2484_v8 }
 0x192   :  { %2219 = vmatmul.mubr.msk.f32.vlgmr.msra.gmra.mrb[2].mxu0 %vm163_vm2, %v328_v17 }
 0x193   :  { %2228 = vmatprep.mubr.msk.f32.mxu0 %vm2485_vm1, %v2484_v8  ;;  %2227 = vmatpush3.msra.mxu0 %v2627_v34 }
 0x194   :  { %2236 = vmatprep.subr.mxu0 %v2484_v8 }
 0x261   :  { %v235_v18 = vpop.f32.mrb[0].mxu1 }
 0x262   :  { %v2210_v19 = vpop.f32.mrb[1].mxu1  ;;  %v239_v20 = vsel %vm163_vm2, %v235_v18, -inf }
 0x263   :  { %240 = vmax.xlane.f32.xlu1 %v239_v20  ;;  %v2688_v20 = vmul.f32 0.35355338, %v2591_v11 }
 0x265   :  { %v401_v21 = vpop.f32.mrb[2].mxu0 }
 0x266   :  { %v2220_v22 = vpop.f32.mrb[3].mxu0  ;;  %v405_v23 = vsel %vm163_vm2, %v401_v21, -inf }
 0x267   :  { %406 = vmax.xlane.f32.xlu0 %v405_v23 }
 0x2f0   :  { %v241_v24 = vpop.xlane.xlu1 %240 }
 0x2f1   :  { %v242_v25 = vsub.f32 %v235_v18, %v241_v24 }
 0x2f3   :  { %v243_v26 = vmul.f32 1.442695, %v242_v25 }
 0x2f4   :  { %v407_v27 = vpop.xlane.xlu0 %406 }
 0x2f5   :  { %2353 = vpow2.f32 %v243_v26  ;;  %v408_v28 = vsub.f32 %v401_v21, %v407_v27 }
 0x2f7   :  { %v409_v29 = vmul.f32 1.442695, %v408_v28 }
 0x2f9   :  { %2355 = vpow2.f32 %v409_v29  ;;  %v2708_v29 = vld [vmem:[#allocation7 + $0x18] sm:$0xff] }
 0x2ff   :  { %v2354_v30 = vpop.eup %2353 }
 0x300   :  { %v245_v31 = vsel %vm163_vm2, %v2354_v30, 0.0 }
 0x301   :  { %246 = vadd.xlane.f32.xlu0 %v245_v31 }
 0x303   :  { %v2356_v32 = vpop.eup %2355 }
 0x304   :  { %v411_v33 = vsel %vm163_vm2, %v2356_v32, 0.0 }
 0x305   :  { %412 = vadd.xlane.f32.xlu1 %v411_v33 }
 0x316   :  { %416 = vrot.lane.b32.xlu1 %v2593_v13, %s2489_s2 }
 0x317   :  { %250 = vrot.lane.b32.xlu0 %v2593_v13, %s2490_s10 }
 0x31a   :  { %641 = vrot.lane.b32.xlu1 %v2593_v13, %s2491_s11 }
 0x31b   :  { %639 = vrot.lane.b32.xlu0 %v2598_v14, %s2492_s12 }
 0x38e   :  { %v247_v35 = vpop.xlane.xlu0 %246 }
 0x38f   :  { %2357 = vrcp.f32 %v247_v35 }
 0x392   :  { %v251_v36 = vpop.permute.xlu0 %250  ;;  %v413_v37 = vpop.xlane.xlu1 %412 }
 0x393   :  { %2359 = vrcp.f32 %v413_v37  ;;  %2212 = vmatpush3.msra.mxu1 %v251_v36 }
 0x394   :  { %2221 = vmatprep.subr.mxu1 %v2484_v8 }
 0x396   :  { %v417_v40 = vpop.permute.xlu1 %416  ;;  %v640_v49 = vpop.permute.xlu0 %639 }
 0x399   :  { %v2358_v38 = vpop.eup %2357 }
 0x39a   :  { %v249_v39 = vmul.f32 %v2358_v38, %v2354_v30  ;;  %v642_v47 = vpop.permute.xlu1 %641 }
 0x39c   :  { %2214 = vmatmul.mubr.msk.f32.vlgmr.msra.gmra.mrb[2].mxu1 %vm163_vm2, %v249_v39 }
 0x39d   :  { %v2360_v41 = vpop.eup %2359  ;;  %2222 = vmatpush3.msra.mxu1 %v417_v40  ;;  %2223 = vmatprep.mubr.msk.f32.mxu1 %vm2485_vm1, %v2484_v8 }
 0x39e   :  { %v415_v42 = vmul.f32 %v2360_v41, %v2356_v32  ;;  %2231 = vmatprep.subr.mxu1 %v2484_v8 }
 0x3a0   :  { %2224 = vmatmul.mubr.msk.f32.vlgmr.msra.gmra.mrb[4].mxu1 %vm163_vm2, %v415_v42 }
 0x3a1   :  { %2233 = vmatprep.mubr.msk.f32.mxu1 %vm2485_vm1, %v2484_v8  ;;  %2232 = vmatpush3.msra.mxu1 %v2639_v43 }
 0x3a2   :  { %2241 = vmatprep.subr.mxu1 %v2484_v8 }
 0x46f   :  { %v322_v44 = vpop.f32.mrb[2].mxu1 }
 0x470   :  { %v2215_v45 = vpop.f32.mrb[3].mxu1  ;;  %2234 = vmatmul.mubr.msk.f32.vlgmr.msra.gmra.mrb[6].mxu1 %vm163_vm2, %v322_v44 }
 0x471   :  { %2243 = vmatprep.mubr.msk.f32.mxu1 %vm2485_vm1, %v2484_v8 }
 0x473   :  { %v488_v46 = vpop.f32.mrb[4].mxu1 }
 0x474   :  { %v2225_v48 = vpop.f32.mrb[5].mxu1  ;;  %2229 = vmatmul.mubr.msk.f32.vlgmr.msra.gmra.mrb[4].mxu0 %vm163_vm2, %v488_v46 }
 0x475   :  { %2237 = vmatpush3.xpose.msk.msra.mxu0 %vm163_vm2, %v642_v47  ;;  %2238 = vmatprep.mubr.msk.f32.mxu0 %vm2485_vm1, %v2484_v8 }
 0x476   :  { %2246 = vmatprep.subr.mxu0 %v2484_v8 }
 0x478   :  { %2239 = vmatmul.mubr.msk.f32.vlgmr.msra.gmra.mrb[6].mxu0 %vm163_vm2, %v640_v49 }
 0x479   :  { %2248 = vmatprep.mubr.msk.f32.mxu0 %vm2485_vm1, %v2484_v8  ;;  %2247 = vmatpush3.msra.mxu0 %v2673_v5 }
 0x47a   :  { %2256 = vmatprep.subr.mxu0 %v2484_v8 }
 0x543   :  { %v635_v50 = vpop.f32.mrb[6].mxu1 }
 0x544   :  { %v2235_v51 = vpop.f32.mrb[7].mxu1 }
 0x547   :  { %v562_v52 = vpop.f32.mrb[4].mxu0 }
 0x548   :  { %v636_v53 = vadd.f32 %v635_v50, %v562_v52  ;;  %v2230_v54 = vpop.f32.mrb[5].mxu0  ;;  %v2731_v50 = vld [vmem:[%s2805_s4] ss:$0 sm:$0xff]  ;;  %s2497_s4 = smov [#allocation8]  }
 0x549   :  { %s2092_s18 = sshll.u32 %s2497_s4, 4  ;;  %s2093_s18 = int_to_ptr.vmem [resolvable:$true] %s2092_s18 }
 0x54a   :  { %s2451_s19 = scalar_lea.vmem %s2093_s18, 256  ;;  %p2456_p11 = scmp.lt.s32.totalorder %s2093_s18, %s2093_s18 }
 0x54b   :  { %v713_v55 = vpop.f32.mrb[6].mxu0  ;;  %p2452_p10 = scmp.ne.s32.totalorder %s2093_s18, %s2451_s19  ;;  %p2457_p12 = scmp.lt.s32.totalorder %s2451_s19, %s2451_s19 }
 0x54c   :  { %v2240_v56 = vpop.f32.mrb[7].mxu0  ;;  %v717_v57 = vsel %vm163_vm2, %v713_v55, -inf }
 0x54d   :  { %718 = vmax.xlane.f32.xlu1 %v717_v57  ;;  %p2458_p13 = por %p2457_p12, %p2456_p11 }
 0x54f   :  { %p2459_p0 = pnand %p2458_p13, %p2452_p10 }
 0x55e   :  { %881 = vrot.lane.b32.xlu1 %v2593_v13, %s2493_s13 }
 0x562   :  { %879 = vrot.lane.b32.xlu1 %v2598_v14, %s2494_s14 }
 0x566   :  { %1128 = vrot.lane.b32.xlu1 %v2591_v11, %s2486_s7 }
 0x5da   :  { %v719_v58 = vpop.xlane.xlu1 %718 }
 0x5db   :  { %v720_v59 = vsub.f32 %v713_v55, %v719_v58 }
 0x5dd   :  { %v721_v60 = vmul.f32 1.442695, %v720_v59 }
 0x5de   :  { %v882_v2 = vpop.permute.xlu1 %881 }
 0x5df   :  { %2361 = vpow2.f32 %v721_v60 }
 0x5e2   :  { %v880_v4 = vpop.permute.xlu1 %879 }
 0x5e6   :  { %v1129_v23 = vpop.permute.xlu1 %1128 }
 0x5e9   :  { %v2362_v61 = vpop.eup %2361 }
 0x5ea   :  { %v723_v62 = vsel %vm163_vm2, %v2362_v61, 0.0 }
 0x5eb   :  { %724 = vadd.xlane.f32.xlu0 %v723_v62 }
 0x601   :  { %728 = vrot.lane.b32.xlu0 %v2593_v13, %s2495_s15 }
 0x678   :  { %v725_v63 = vpop.xlane.xlu0 %724 }
 0x679   :  { %2363 = vrcp.f32 %v725_v63 }
 0x67c   :  { %v729_v0 = vpop.permute.xlu0 %728 }
 0x67d   :  { %2242 = vmatpush3.msra.mxu1 %v729_v0 }
 0x67e   :  { %2251 = vmatprep.subr.mxu1 %v2484_v8 }
 0x683   :  { %v2364_v1 = vpop.eup %2363 }
 0x684   :  { %v727_v3 = vmul.f32 %v2364_v1, %v2362_v61 }
 0x686   :  { %2244 = vmatmul.mubr.msk.f32.vlgmr.msra.gmra.mrb[8].mxu1 %vm163_vm2, %v727_v3 }
 0x687   :  { %2252 = vmatpush3.xpose.msk.msra.mxu1 %vm163_vm2, %v882_v2  ;;  %2253 = vmatprep.mubr.msk.f32.mxu1 %vm2485_vm1, %v2484_v8 }
 0x688   :  { %2261 = vmatprep.subr.mxu1 %v2484_v8 }
 0x68a   :  { %2254 = vmatmul.mubr.msk.f32.vlgmr.msra.gmra.mrb[10].mxu1 %vm163_vm2, %v880_v4 }
 0x68b   :  { %2263 = vmatprep.mubr.msk.f32.mxu1 %vm2485_vm1, %v2484_v8  ;;  %2262 = vmatpush3.msra.mxu1 %v2708_v29 }
 0x68c   :  { %2271 = vmatprep.subr.mxu1 %v2484_v8 }
 0x759   :  { %v800_v6 = vpop.f32.mrb[8].mxu1 }
 0x75a   :  { %v2245_v7 = vpop.f32.mrb[9].mxu1  ;;  %2249 = vmatmul.mubr.msk.f32.vlgmr.msra.gmra.mrb[8].mxu0 %vm163_vm2, %v800_v6 }
 0x75b   :  { %2258 = vmatprep.mubr.msk.f32.mxu0 %vm2485_vm1, %v2484_v8 }
 0x75d   :  { %v953_v9 = vpop.f32.mrb[10].mxu1 }
 0x75e   :  { %v2255_v10 = vpop.f32.mrb[11].mxu1  ;;  %v957_v12 = vsel %vm163_vm2, %v953_v9, -inf }
 0x75f   :  { %958 = vmax.xlane.f32.xlu0 %v957_v12 }
 0x775   :  { %968 = vrot.lane.b32.xlu0 %v2593_v13, %s2496_s16 }
 0x779   :  { %1295 = vrot.lane.b32.xlu0 %v2591_v11, %s2488_s9 }
 0x7ec   :  { %v959_v14 = vpop.xlane.xlu0 %958 }
 0x7ed   :  { %v960_v15 = vsub.f32 %v953_v9, %v959_v14 }
 0x7ef   :  { %v961_v16 = vmul.f32 1.442695, %v960_v15 }
 0x7f0   :  { %v969_v17 = vpop.permute.xlu0 %968 }
 0x7f1   :  { %2365 = vpow2.f32 %v961_v16  ;;  %2257 = vmatpush3.msra.mxu0 %v969_v17 }
 0x7f2   :  { %2266 = vmatprep.subr.mxu0 %v2484_v8 }
 0x7f4   :  { %v1296_v27 = vpop.permute.xlu0 %1295 }
 0x7fb   :  { %v2366_v18 = vpop.eup %2365 }
 0x7fc   :  { %v963_v19 = vsel %vm163_vm2, %v2366_v18, 0.0 }
 0x7fd   :  { %964 = vadd.xlane.f32.xlu1 %v963_v19 }
 0x80e   :  { %1293 = vrot.lane.b32.xlu1 %v2688_v20, %s2487_s8 }
 0x82d   :  { %v874_v13 = vpop.f32.mrb[8].mxu0 }
 0x82e   :  { %v878_v21 = vadd.f32 %v874_v13, %v636_v53  ;;  %v2250_v22 = vpop.f32.mrb[9].mxu0 }
 0x88a   :  { %v965_v24 = vpop.xlane.xlu1 %964 }
 0x88b   :  { %2367 = vrcp.f32 %v965_v24 }
 0x88e   :  { %v1294_v28 = vpop.permute.xlu1 %1293 }
 0x895   :  { %v2368_v25 = vpop.eup %2367 }
 0x896   :  { %v967_v26 = vmul.f32 %v2368_v25, %v2366_v18 }
 0x898   :  { %2259 = vmatmul.mubr.msk.f32.vlgmr.msra.gmra.mrb[10].mxu0 %vm163_vm2, %v967_v26 }
 0x899   :  { %2267 = vmatpush3.xpose.msk.msra.mxu0 %vm163_vm2, %v1129_v23  ;;  %2268 = vmatprep.mubr.msk.f32.mxu0 %vm2485_vm1, %v2484_v8 }
 0x89a   :  { %2276 = vmatprep.subr.mxu0 %v2484_v8 }
 0x89c   :  { %2269 = vmatmul.mubr.msk.f32.vlgmr.msra.gmra.mrb[12].mxu0 %vm163_vm2, %v2688_v20 }
 0x89d   :  { %2277 = vmatpush3.xpose.msk.msra.mxu0 %vm163_vm2, %v1296_v27  ;;  %2278 = vmatprep.mubr.msk.f32.mxu0 %vm2485_vm1, %v2484_v8 }
 0x89e   :  { %2286 = vmatprep.subr.mxu0 %v2484_v8 }
 0x8a0   :  { %2279 = vmatmul.mubr.msk.f32.vlgmr.msra.gmra.mrb[14].mxu0 %vm163_vm2, %v1294_v28 }
 0x8a1   :  { %2287 = vmatpush3.msra.mxu0 %v2627_v34  ;;  %2288 = vmatprep.mubr.msk.f32.mxu0 %vm2485_vm1, %v2484_v8 }
 0x8a2   :  { %2296 = vmatprep.subr.mxu0 %v2484_v8 }
 0x96b   :  { %v1040_v30 = vpop.f32.mrb[10].mxu0 }
 0x96c   :  { %v2260_v31 = vpop.f32.mrb[11].mxu0  ;;  %2264 = vmatmul.mubr.msk.f32.vlgmr.msra.gmra.mrb[12].mxu1 %vm163_vm2, %v1040_v30 }
 0x96d   :  { %2273 = vmatprep.mubr.msk.f32.mxu1 %vm2485_vm1, %v2484_v8 }
 0x96f   :  { %v1201_v32 = vpop.f32.mrb[12].mxu0 }
 0x970   :  { %v2270_v33 = vpop.f32.mrb[13].mxu0  ;;  %v1205_v34 = vsel %vm163_vm2, %v1201_v32, -inf }
 0x971   :  { %1206 = vmax.xlane.f32.xlu0 %v1205_v34 }
 0x973   :  { %v1367_v35 = vpop.f32.mrb[14].mxu0 }
 0x974   :  { %v2280_v36 = vpop.f32.mrb[15].mxu0  ;;  %v1371_v37 = vsel %vm163_vm2, %v1367_v35, -inf }
 0x975   :  { %1372 = vmax.xlane.f32.xlu1 %v1371_v37 }
 0x986   :  { %1216 = vrot.lane.b32.xlu1 %v2591_v11, %s2490_s10 }
 0x98a   :  { %1607 = vrot.lane.b32.xlu1 %v2591_v11, %s2491_s11 }
 0x98e   :  { %1605 = vrot.lane.b32.xlu1 %v2688_v20, %s2492_s12 }
 0x9fe   :  { %v1207_v38 = vpop.xlane.xlu0 %1206 }
 0x9ff   :  { %v1208_v39 = vsub.f32 %v1201_v32, %v1207_v38 }
 0xa01   :  { %v1209_v40 = vmul.f32 1.442695, %v1208_v39 }
 0xa02   :  { %v1373_v41 = vpop.xlane.xlu1 %1372 }
 0xa03   :  { %2369 = vpow2.f32 %v1209_v40  ;;  %v1374_v42 = vsub.f32 %v1367_v35, %v1373_v41 }
 0xa05   :  { %v1375_v44 = vmul.f32 1.442695, %v1374_v42 }
 0xa06   :  { %v1217_v45 = vpop.permute.xlu1 %1216 }
 0xa07   :  { %2371 = vpow2.f32 %v1375_v44  ;;  %2272 = vmatpush3.msra.mxu1 %v1217_v45 }
 0xa08   :  { %2281 = vmatprep.subr.mxu1 %v2484_v8 }
 0xa0a   :  { %v1608_v0 = vpop.permute.xlu1 %1607 }
 0xa0d   :  { %v2370_v46 = vpop.eup %2369 }
 0xa0e   :  { %v1211_v47 = vsel %vm163_vm2, %v2370_v46, 0.0 }
 0xa0f   :  { %1212 = vadd.xlane.f32.xlu0 %v1211_v47 }
 0xa11   :  { %v2372_v48 = vpop.eup %2371 }
 0xa12   :  { %v1377_v49 = vsel %vm163_vm2, %v2372_v48, 0.0 }
 0xa13   :  { %1378 = vadd.xlane.f32.xlu0 %v1377_v49 }
 0xa29   :  { %1382 = vrot.lane.b32.xlu0 %v2591_v11, %s2489_s2 }
 0xa3f   :  { %v1114_v51 = vpop.f32.mrb[12].mxu1 }
 0xa40   :  { %v1118_v52 = vadd.f32 %v1114_v51, %v878_v21  ;;  %v2265_v53 = vpop.f32.mrb[13].mxu1 }
 0xa42   :  { %v1125_v54 = vadd.f32 %v2731_v50, %v1118_v52 }
 0xa44   :  { %1126 = vst.msk [vmem:[#allocation8] sm:$0xff] %vm75_vm0, %v1125_v54 }
 0xa9c   :  { %v1213_v55 = vpop.xlane.xlu0 %1212 }
 0xa9d   :  { %2373 = vrcp.f32 %v1213_v55 }
 0xaa0   :  { %v1379_v56 = vpop.xlane.xlu0 %1378 }
 0xaa1   :  { %2375 = vrcp.f32 %v1379_v56 }
 0xaa4   :  { %v1383_v59 = vpop.permute.xlu0 %1382 }
 0xaa7   :  { %v2374_v57 = vpop.eup %2373 }
 0xaa8   :  { %v1215_v58 = vmul.f32 %v2374_v57, %v2370_v46 }
 0xaaa   :  { %2274 = vmatmul.mubr.msk.f32.vlgmr.msra.gmra.mrb[14].mxu1 %vm163_vm2, %v1215_v58 }
 0xaab   :  { %v2376_v60 = vpop.eup %2375  ;;  %2282 = vmatpush3.msra.mxu1 %v1383_v59  ;;  %2283 = vmatprep.mubr.msk.f32.mxu1 %vm2485_vm1, %v2484_v8 }
 0xaac   :  { %v1381_v61 = vmul.f32 %v2376_v60, %v2372_v48  ;;  %2291 = vmatprep.subr.mxu1 %v2484_v8 }
 0xaae   :  { %2284 = vmatmul.mubr.msk.f32.vlgmr.msra.gmra.mrb[16].mxu1 %vm163_vm2, %v1381_v61 }
 0xaaf   :  { %2292 = vmatpush3.msra.mxu1 %v2639_v43  ;;  %2293 = vmatprep.mubr.msk.f32.mxu1 %vm2485_vm1, %v2484_v8  ;;  %v1606_v43 = vpop.permute.xlu1 %1605 }
 0xab0   :  { %2301 = vmatprep.subr.mxu1 %v2484_v8 }
 0xb7d   :  { %v1288_v62 = vpop.f32.mrb[14].mxu1 }
 0xb7e   :  { %v2275_v63 = vpop.f32.mrb[15].mxu1  ;;  %2294 = vmatmul.mubr.msk.f32.vlgmr.msra.gmra.mrb[18].mxu1 %vm163_vm2, %v1288_v62 }
 0xb7f   :  { %2303 = vmatprep.mubr.msk.f32.mxu1 %vm2485_vm1, %v2484_v8 }
 0xb81   :  { %v1454_v1 = vpop.f32.mrb[16].mxu1 }
 0xb82   :  { %v2285_v2 = vpop.f32.mrb[17].mxu1  ;;  %2289 = vmatmul.mubr.msk.f32.vlgmr.msra.gmra.mrb[16].mxu0 %vm163_vm2, %v1454_v1 }
 0xb83   :  { %2297 = vmatpush3.xpose.msk.msra.mxu0 %vm163_vm2, %v1608_v0  ;;  %2298 = vmatprep.mubr.msk.f32.mxu0 %vm2485_vm1, %v2484_v8 }
 0xb84   :  { %2306 = vmatprep.subr.mxu0 %v2484_v8 }
 0xb86   :  { %2299 = vmatmul.mubr.msk.f32.vlgmr.msra.gmra.mrb[18].mxu0 %vm163_vm2, %v1606_v43 }
 0xb87   :  { %2307 = vmatpush3.msra.mxu0 %v2673_v5  ;;  %2308 = vmatprep.mubr.msk.f32.mxu0 %vm2485_vm1, %v2484_v8 }
 0xb88   :  { %2316 = vmatprep.subr.mxu0 %v2484_v8 }
 0xc51   :  { %v1601_v3 = vpop.f32.mrb[18].mxu1 }
 0xc52   :  { %v2295_v4 = vpop.f32.mrb[19].mxu1 }
 0xc55   :  { %v1528_v6 = vpop.f32.mrb[16].mxu0 }
 0xc56   :  { %v1602_v7 = vadd.f32 %v1601_v3, %v1528_v6  ;;  %v2290_v9 = vpop.f32.mrb[17].mxu0 }
 0xc59   :  { %v1679_v10 = vpop.f32.mrb[18].mxu0 }
 0xc5a   :  { %v2300_v12 = vpop.f32.mrb[19].mxu0  ;;  %v1683_v14 = vsel %vm163_vm2, %v1679_v10, -inf }
 0xc5b   :  { %1684 = vmax.xlane.f32.xlu0 %v1683_v14 }
 0xc71   :  { %1694 = vrot.lane.b32.xlu0 %v2591_v11, %s2495_s15 }
 0xc75   :  { %1845 = vrot.lane.b32.xlu0 %v2688_v20, %s2494_s14 }
 0xce8   :  { %v1685_v5 = vpop.xlane.xlu0 %1684 }
 0xce9   :  { %v1686_v15 = vsub.f32 %v1679_v10, %v1685_v5 }
 0xceb   :  { %v1687_v16 = vmul.f32 1.442695, %v1686_v15 }
 0xcec   :  { %v1695_v17 = vpop.permute.xlu0 %1694 }
 0xced   :  { %2377 = vpow2.f32 %v1687_v16  ;;  %2302 = vmatpush3.msra.mxu1 %v1695_v17 }
 0xcee   :  { %2311 = vmatprep.subr.mxu1 %v2484_v8 }
 0xcf0   :  { %v1846_v23 = vpop.permute.xlu0 %1845 }
 0xcf7   :  { %v2378_v18 = vpop.eup %2377 }
 0xcf8   :  { %v1689_v19 = vsel %vm163_vm2, %v2378_v18, 0.0 }
 0xcf9   :  { %1690 = vadd.xlane.f32.xlu1 %v1689_v19 }
 0xd0a   :  { %1847 = vrot.lane.b32.xlu1 %v2591_v11, %s2493_s13 }
 0xd86   :  { %v1691_v13 = vpop.xlane.xlu1 %1690 }
 0xd87   :  { %2379 = vrcp.f32 %v1691_v13 }
 0xd8a   :  { %v1848_v20 = vpop.permute.xlu1 %1847 }
 0xd91   :  { %v2380_v21 = vpop.eup %2379 }
 0xd92   :  { %v1693_v22 = vmul.f32 %v2380_v21, %v2378_v18 }
 0xd94   :  { %2304 = vmatmul.mubr.msk.f32.vlgmr.msra.gmra.mrb[20].mxu1 %vm163_vm2, %v1693_v22 }
 0xd95   :  { %2312 = vmatpush3.xpose.msk.msra.mxu1 %vm163_vm2, %v1848_v20  ;;  %2313 = vmatprep.mubr.msk.f32.mxu1 %vm2485_vm1, %v2484_v8 }
 0xd96   :  { %2321 = vmatprep.subr.mxu1 %v2484_v8 }
 0xd98   :  { %2314 = vmatmul.mubr.msk.f32.vlgmr.msra.gmra.mrb[22].mxu1 %vm163_vm2, %v1846_v23 }
 0xd99   :  { %2322 = vmatpush3.msra.mxu1 %v2708_v29  ;;  %2323 = vmatprep.mubr.msk.f32.mxu1 %vm2485_vm1, %v2484_v8 }
 0xe67   :  { %v1766_v24 = vpop.f32.mrb[20].mxu1 }
 0xe68   :  { %v2305_v25 = vpop.f32.mrb[21].mxu1  ;;  %2309 = vmatmul.mubr.msk.f32.vlgmr.msra.gmra.mrb[20].mxu0 %vm163_vm2, %v1766_v24 }
 0xe69   :  { %2318 = vmatprep.mubr.msk.f32.mxu0 %vm2485_vm1, %v2484_v8 }
 0xe6b   :  { %v1919_v26 = vpop.f32.mrb[22].mxu1 }
 0xe6c   :  { %v2315_v27 = vpop.f32.mrb[23].mxu1  ;;  %v1923_v28 = vsel %vm163_vm2, %v1919_v26, -inf }
 0xe6d   :  { %1924 = vmax.xlane.f32.xlu1 %v1923_v28 }
 0xefa   :  { %v1925_v30 = vpop.xlane.xlu1 %1924 }
 0xefb   :  { %v1926_v31 = vsub.f32 %v1919_v26, %v1925_v30 }
 0xefd   :  { %v1927_v32 = vmul.f32 1.442695, %v1926_v31 }
 0xeff   :  { %2381 = vpow2.f32 %v1927_v32 }
 0xf09   :  { %v2382_v29 = vpop.eup %2381 }
 0xf0a   :  { %v1929_v33 = vsel %vm163_vm2, %v2382_v29, 0.0 }
 0xf0b   :  { %1930 = vadd.xlane.f32.xlu0 %v1929_v33 }
 0xf21   :  { %1934 = vrot.lane.b32.xlu0 %v2591_v11, %s2496_s16 }
 0xf3b   :  { %v1840_v34 = vpop.f32.mrb[20].mxu0 }
 0xf3c   :  { %v1844_v35 = vadd.f32 %v1840_v34, %v1602_v7  ;;  %v2310_v36 = vpop.f32.mrb[21].mxu0 }
 0xf98   :  { %v1931_v8 = vpop.xlane.xlu0 %1930 }
 0xf99   :  { %2383 = vrcp.f32 %v1931_v8 }
 0xf9c   :  { %v1935_v37 = vpop.permute.xlu0 %1934 }
 0xf9d   :  { %2317 = vmatpush3.msra.mxu0 %v1935_v37 }
 0xfa3   :  { %v2384_v38 = vpop.eup %2383 }
 0xfa4   :  { %v1933_v39 = vmul.f32 %v2384_v38, %v2382_v29 }
 0xfa6   :  { %2319 = vmatmul.mubr.msk.f32.vlgmr.msra.gmra.mrb[22].mxu0 %vm163_vm2, %v1933_v39 }
0x1079   :  { %v2006_v40 = vpop.f32.mrb[22].mxu0 }
0x107a   :  { %v2320_v41 = vpop.f32.mrb[23].mxu0  ;;  %2324 = vmatmul.mubr.msk.f32.vlgmr.msra.gmra.mrb[24].mxu1 %vm163_vm2, %v2006_v40 }
0x114d   :  { %v2080_v42 = vpop.f32.mrb[24].mxu1 }
0x114e   :  { %v2084_v44 = vadd.f32 %v2080_v42, %v1844_v35  ;;  %v2325_v11 = vpop.f32.mrb[25].mxu1 }
0x1150   :  { %v2085_v45 = vadd.f32 %v2731_v50, %v2084_v44 }
0x1152   :  { %2086 = vst.msk [vmem:[#allocation8 + $0x8] sm:$0xff] %vm75_vm0, %v2085_v45 }
0x1153   :  { %2462 = shalt.err (!%p2459_p0)
}
0x1154   :  { %s2463_s23 = scalar_lea.hbm %s2806_s5, 256 }
0x1155   :  { %p2464_p1 = scmp.ne.s32.totalorder %s2806_s5, %s2463_s23  ;;  %p2467_p2 = scmp.lt.u32.totalorder %s2463_s23, %s2806_s5 }
0x1157   :  { %p2469_p3 = pnand %p2467_p2, %p2464_p1 }
0x1159   :  { %2472 = shalt.err (!%p2469_p3)
}
0x115a   :  { %2098 = dma.vmem_to_hbm [thread:$0]  %s2093_s18, 256, %s2806_s5, [#allocation4], %s2481_s30, %s2481_s30, %s2482_s6  }
0x115b   :  { %2477 = dma.done.wait [#allocation4], 256  }
0x115c   :  { %2478 = vsyncadd [#allocation4], 4294967040 }
0x115d   :  { %2102 = vsyncpa [#allocation3], 1 }
0x115e   :  { %2103 = vsyncpa [#allocation6], 1 }
0x115f   :  { %2104 = vsyncpa [#allocation4], 1 }

</bundles_post_ra>
